<compile_context>
chip_gen: v7x
topology: tpu7x:2x2x1
jax: 0.10.0
libtpu: 0.0.40
codegen_flags: <defaults>
</compile_context>

<pallas_src>
import jax
import jax.numpy as jnp
from jax.experimental import pallas as pl
from jax.experimental.pallas import tpu as pltpu


def action_injector_kernel(x_ref, a_ref, w1_ref, b1_ref, w2_ref, b2_ref, o_ref):
    # x_ref  : (1, Cp, THW)  one HW-tile of one batch element (packed channels)
    # a_ref  : (1, 1, A)     that batch element's action vector
    # w1/w2  : (Cp, A)       (row-repacked) nn.Linear weights
    # b1/b2  : (Cp, 1)       (row-repacked) biases, column shaped
    a = a_ref[0].astype(jnp.float32)                       # (1, A)

    # dense{1,2}(action) per packed channel, on VPU (mul) + XLU (lane reduce);
    # no MXU push/pop for a 1-lane result.
    w1 = w1_ref[...].astype(jnp.float32)                   # (Cp, A)
    w2 = w2_ref[...].astype(jnp.float32)
    m1 = jnp.sum(w1 * a, axis=1, keepdims=True) + b1_ref[...].astype(jnp.float32)
    m2 = jnp.sum(w2 * a, axis=1, keepdims=True) + b2_ref[...].astype(jnp.float32)

    gate = jax.nn.sigmoid(m1).astype(x_ref.dtype)          # (Cp, 1)
    shift = m2.astype(x_ref.dtype)                         # (Cp, 1)

    # Broadcast FMA in the native activation dtype (no full-slab f32 upcast).
    o_ref[0] = (x_ref[0] * gate + shift).astype(o_ref.dtype)


def action_injector(x, action, w1, b1, w2, b2,
                    *, max_lanes=2048, max_block_bytes=2 * 1024 * 1024):
    """x: (B, C, H, W) NCHW, action: (B, A). Returns (B, C, H, W)."""
    B, C, H, W = x.shape
    A = action.shape[1]
    HW = H * W

    # --- sublane repacking: fold lanes into sublanes when C < 8 -------------
    k = 1
    if C < 8 and 8 % C == 0 and HW % (8 // C) == 0:
        k = 8 // C
    Cp, HWp = C * k, HW // k

    x3 = x.reshape(B, Cp, HWp)                 # contiguous -> free HBM view
    a3 = action.reshape(B, 1, A)

    # Repack params so packed row c*k+j carries channel c's mask.
    if k > 1:
        w1p = jnp.repeat(w1, k, axis=0)
        w2p = jnp.repeat(w2, k, axis=0)
        b1p = jnp.repeat(b1, k).reshape(Cp, 1)
        b2p = jnp.repeat(b2, k).reshape(Cp, 1)
    else:
        w1p, w2p = w1, w2
        b1p, b2p = b1.reshape(Cp, 1), b2.reshape(Cp, 1)

    # --- lane tile: largest multiple of 128 dividing HWp, VMEM-capped -------
    itemsize = jnp.dtype(x.dtype).itemsize
    lane_cap = max(128, min(max_lanes, max_block_bytes // max(1, Cp * itemsize)))
    THW = HWp  # fallback: full-extent block (valid BlockSpec even if not 128-aligned)
    if HWp % 128 == 0:
        t = (lane_cap // 128) * 128
        while t >= 128:
            if HWp % t == 0:
                THW = t
                break
            t -= 128
    # Note: if HW is not a multiple of 128 the single full-extent block still
    # works correctly; padding HW to 128 would make stores lane-dense but costs
    # an extra HBM pad/slice pass, so it is intentionally not done here.
    num_hw = HWp // THW

    cost = pl.CostEstimate(
        flops=2 * B * Cp * HWp + 4 * B * Cp * A,
        transcendentals=B * Cp * num_hw,
        bytes_accessed=2 * B * Cp * HWp * itemsize
        + B * A * itemsize
        + 2 * (Cp * A + Cp) * 4,
    )

    out = pl.pallas_call(
        action_injector_kernel,
        out_shape=jax.ShapeDtypeStruct((B, Cp, HWp), x.dtype),
        grid=(B, num_hw),
        in_specs=[
            pl.BlockSpec((1, Cp, THW), lambda b, h: (b, 0, h)),  # x tile
            pl.BlockSpec((1, 1, A), lambda b, h: (b, 0, 0)),     # action (per batch)
            pl.BlockSpec((Cp, A), lambda b, h: (0, 0)),          # dense1 weight
            pl.BlockSpec((Cp, 1), lambda b, h: (0, 0)),          # dense1 bias
            pl.BlockSpec((Cp, A), lambda b, h: (0, 0)),          # dense2 weight
            pl.BlockSpec((Cp, 1), lambda b, h: (0, 0)),          # dense2 bias
        ],
        out_specs=pl.BlockSpec((1, Cp, THW), lambda b, h: (b, 0, h)),
        compiler_params=pltpu.CompilerParams(
            dimension_semantics=("parallel", "parallel")),
        cost_estimate=cost,
    )(x3, a3, w1p, b1p, w2p, b2p)

    return out.reshape(B, C, H, W)


def reference(x, action, w1, b1, w2, b2):
    B, C, H, W = x.shape
    m1 = action @ w1.T + b1
    m2 = action @ w2.T + b2
    m1 = m1.reshape(B, C, 1, 1)
    m2 = m2.reshape(B, C, 1, 1)
    return x * jax.nn.sigmoid(m1) + m2


if __name__ == "__main__":
    # Small shapes consistent with the module: size == x.shape[1] (channels).
    B, C, H, W = 2, 4, 16, 16
    n_action = 8
    size = C

    key = jax.random.PRNGKey(0)
    kx, ka, kw1, kb1, kw2, kb2 = jax.random.split(key, 6)

    x = jax.random.normal(kx, (B, C, H, W), dtype=jnp.float32)
    action = jax.random.normal(ka, (B, n_action), dtype=jnp.float32)

    # Deterministic nn.Linear-style init: U(-1/sqrt(fan_in), 1/sqrt(fan_in)).
    bound = 1.0 / jnp.sqrt(jnp.float32(n_action))
    w1 = jax.random.uniform(kw1, (size, n_action), jnp.float32, -bound, bound)
    b1 = jax.random.uniform(kb1, (size,), jnp.float32, -bound, bound)
    w2 = jax.random.uniform(kw2, (size, n_action), jnp.float32, -bound, bound)
    b2 = jax.random.uniform(kb2, (size,), jnp.float32, -bound, bound)

    out = action_injector(x, action, w1, b1, w2, b2)
    out = jax.block_until_ready(out)

    ref = reference(x, action, w1, b1, w2, b2)
    assert out.shape == (B, C, H, W)
    assert jnp.allclose(out, ref, atol=1e-5, rtol=1e-5)

    print("KERNEL_OK")
</pallas_src>

<mosaic_0001>
module attributes {stable_mosaic.version = 11 : i64} {
  func.func @action_injector_kernel(%arg0: i32, %arg1: i32, %arg2: memref<1x8x128xf32, #tpu.memory_space<vmem>>, %arg3: memref<1x1x8xf32, #tpu.memory_space<vmem>>, %arg4: memref<8x8xf32, #tpu.memory_space<vmem>>, %arg5: memref<8x1xf32, #tpu.memory_space<vmem>>, %arg6: memref<8x8xf32, #tpu.memory_space<vmem>>, %arg7: memref<8x1xf32, #tpu.memory_space<vmem>>, %arg8: memref<1x8x128xf32, #tpu.memory_space<vmem>>) attributes {dimension_semantics = [#tpu.dimension_semantics<parallel>, #tpu.dimension_semantics<parallel>], iteration_bounds = array<i64: 2, 1>, scalar_prefetch = 0 : i64, scratch_operands = 0 : i64, tpu.core_type = #tpu.core_type<tc>, window_params = [{transform_indices = @transform_0, window_bounds = array<i64: 1, 8, 128>}, {transform_indices = @transform_1, window_bounds = array<i64: 1, 1, 8>}, {pipeline_mode = #tpu.pipeline_mode<synchronous>, transform_indices = @transform_2, window_bounds = array<i64: 8, 8>}, {pipeline_mode = #tpu.pipeline_mode<synchronous>, transform_indices = @transform_3, window_bounds = array<i64: 8, 1>}, {pipeline_mode = #tpu.pipeline_mode<synchronous>, transform_indices = @transform_4, window_bounds = array<i64: 8, 8>}, {pipeline_mode = #tpu.pipeline_mode<synchronous>, transform_indices = @transform_5, window_bounds = array<i64: 8, 1>}, {transform_indices = @transform_6, window_bounds = array<i64: 1, 8, 128>}]} {
    %c0 = arith.constant 0 : index
    %c0_0 = arith.constant 0 : index
    %c0_1 = arith.constant 0 : index
    %0 = vector.load %arg3[%c0, %c0_0, %c0_1] : memref<1x1x8xf32, #tpu.memory_space<vmem>>, vector<1x1x8xf32>
    %1 = vector.shape_cast %0 : vector<1x1x8xf32> to vector<1x8xf32>
    %c0_2 = arith.constant 0 : index
    %c0_3 = arith.constant 0 : index
    %2 = vector.load %arg4[%c0_2, %c0_3] : memref<8x8xf32, #tpu.memory_space<vmem>>, vector<8x8xf32>
    %c0_4 = arith.constant 0 : index
    %c0_5 = arith.constant 0 : index
    %3 = vector.load %arg6[%c0_4, %c0_5] : memref<8x8xf32, #tpu.memory_space<vmem>>, vector<8x8xf32>
    %4 = vector.broadcast %1 : vector<1x8xf32> to vector<8x8xf32>
    %5 = arith.mulf %2, %4 : vector<8x8xf32>
    %cst = arith.constant dense<0.000000e+00> : vector<8xf32>
    %6 = vector.multi_reduction <add>, %5, %cst [1] : vector<8x8xf32> to vector<8xf32>
    %7 = vector.shape_cast %6 : vector<8xf32> to vector<8x1xf32>
    %c0_6 = arith.constant 0 : index
    %c0_7 = arith.constant 0 : index
    %8 = vector.load %arg5[%c0_6, %c0_7] : memref<8x1xf32, #tpu.memory_space<vmem>>, vector<8x1xf32>
    %9 = arith.addf %7, %8 : vector<8x1xf32>
    %10 = vector.broadcast %1 : vector<1x8xf32> to vector<8x8xf32>
    %11 = arith.mulf %3, %10 : vector<8x8xf32>
    %cst_8 = arith.constant dense<0.000000e+00> : vector<8xf32>
    %12 = vector.multi_reduction <add>, %11, %cst_8 [1] : vector<8x8xf32> to vector<8xf32>
    %13 = vector.shape_cast %12 : vector<8xf32> to vector<8x1xf32>
    %c0_9 = arith.constant 0 : index
    %c0_10 = arith.constant 0 : index
    %14 = vector.load %arg7[%c0_9, %c0_10] : memref<8x1xf32, #tpu.memory_space<vmem>>, vector<8x1xf32>
    %15 = arith.addf %13, %14 : vector<8x1xf32>
    %16 = arith.negf %9 : vector<8x1xf32>
    %17 = math.exp %16 : vector<8x1xf32>
    %cst_11 = arith.constant 1.000000e+00 : f32
    %18 = vector.broadcast %cst_11 : f32 to vector<8x1xf32>
    %19 = arith.addf %18, %17 : vector<8x1xf32>
    %20 = arith.divf %18, %19 : vector<8x1xf32>
    %c0_12 = arith.constant 0 : index
    %c0_13 = arith.constant 0 : index
    %c0_14 = arith.constant 0 : index
    %21 = vector.load %arg2[%c0_12, %c0_13, %c0_14] : memref<1x8x128xf32, #tpu.memory_space<vmem>>, vector<1x8x128xf32>
    %22 = vector.shape_cast %21 : vector<1x8x128xf32> to vector<8x128xf32>
    %23 = vector.broadcast %20 : vector<8x1xf32> to vector<8x128xf32>
    %24 = arith.mulf %22, %23 : vector<8x128xf32>
    %25 = vector.broadcast %15 : vector<8x1xf32> to vector<8x128xf32>
    %26 = arith.addf %24, %25 : vector<8x128xf32>
    %c0_15 = arith.constant 0 : index
    %c0_16 = arith.constant 0 : index
    %c0_17 = arith.constant 0 : index
    %27 = vector.load %arg8[%c0_15, %c0_16, %c0_17] : memref<1x8x128xf32, #tpu.memory_space<vmem>>, vector<1x8x128xf32>
    %28 = vector.shape_cast %27 : vector<1x8x128xf32> to vector<8x128xf32>
    %29 = vector.shape_cast %26 : vector<8x128xf32> to vector<1x8x128xf32>
    tpu.vector_store %arg8[%c0_15, %c0_16, %c0_17], %29 {strides = array<i32>} : memref<1x8x128xf32, #tpu.memory_space<vmem>>, vector<1x8x128xf32>,
    return
  }
  func.func @transform_0(%arg0: i32, %arg1: i32) -> (i32, i32, i32) {
    %c0_i32 = arith.constant 0 : i32
    %c0_i32_0 = arith.constant 0 : i32
    return %arg0, %c0_i32, %arg1 : i32, i32, i32
  }
  func.func @transform_1(%arg0: i32, %arg1: i32) -> (i32, i32, i32) {
    %c0_i32 = arith.constant 0 : i32
    %c0_i32_0 = arith.constant 0 : i32
    %c0_i32_1 = arith.constant 0 : i32
    return %arg0, %c0_i32, %c0_i32_0 : i32, i32, i32
  }
  func.func @transform_2(%arg0: i32, %arg1: i32) -> (i32, i32) {
    %c0_i32 = arith.constant 0 : i32
    %c0_i32_0 = arith.constant 0 : i32
    %c0_i32_1 = arith.constant 0 : i32
    return %c0_i32, %c0_i32_0 : i32, i32
  }
  func.func @transform_3(%arg0: i32, %arg1: i32) -> (i32, i32) {
    %c0_i32 = arith.constant 0 : i32
    %c0_i32_0 = arith.constant 0 : i32
    %c0_i32_1 = arith.constant 0 : i32
    return %c0_i32, %c0_i32_0 : i32, i32
  }
  func.func @transform_4(%arg0: i32, %arg1: i32) -> (i32, i32) {
    %c0_i32 = arith.constant 0 : i32
    %c0_i32_0 = arith.constant 0 : i32
    %c0_i32_1 = arith.constant 0 : i32
    return %c0_i32, %c0_i32_0 : i32, i32
  }
  func.func @transform_5(%arg0: i32, %arg1: i32) -> (i32, i32) {
    %c0_i32 = arith.constant 0 : i32
    %c0_i32_0 = arith.constant 0 : i32
    %c0_i32_1 = arith.constant 0 : i32
    return %c0_i32, %c0_i32_0 : i32, i32
  }
  func.func @transform_6(%arg0: i32, %arg1: i32) -> (i32, i32, i32) {
    %c0_i32 = arith.constant 0 : i32
    %c0_i32_0 = arith.constant 0 : i32
    return %arg0, %c0_i32, %arg1 : i32, i32, i32
  }
}

</mosaic_0001>

<bundles_post_ra>
// kernel: tpu_custom_call.1
= control target key start
LH: loop header
LB: loop body
LE: loop exit
PB: predicated region body
PF: predicated region fallthrough
CT: control target
= control target key end

     0   :  { %11 = vsyncpa [#allocation3], 0  ;;  %s879_s0 = inlined_call_operand.vmem [shape: f32[2,8,128], index: 0, kind: input, shape index: {}]   ;;  %s880_s1 = inlined_call_operand.hbm [shape: f32[2,1,8], index: 1, kind: input, shape index: {}]   ;;  %s881_s2 = inlined_call_operand.vmem [shape: f32[8,8], index: 2, kind: input, shape index: {}]   ;;  %s882_s3 = inlined_call_operand.vmem [shape: f32[8,1], index: 3, kind: input, shape index: {}]   ;;  %s883_s4 = inlined_call_operand.vmem [shape: f32[8,8], index: 4, kind: input, shape index: {}]   ;;  %s884_s5 = inlined_call_operand.vmem [shape: f32[8,1], index: 5, kind: input, shape index: {}]   ;;  %s885_s6 = inlined_call_operand.hbm [shape: f32[2,8,128], index: 6, kind: output, shape index: {}]  }
   0x1   :  { %13 = vsyncpa [#allocation3 + $0x1], 0 }
   0x2   :  { %14 = vsyncpa [#allocation4], 0 }
   0x3   :  { %16 = vsyncpa [#allocation4 + $0x1], 0  ;;  %s689_s21 = smov 0   ;;  %s691_s22 = smov 0  }
   0x4   :  { %s693_s23 = smov 0   ;;  %s695_s24 = smov 0  }
   0x5   :  { %s697_s25 = smov 0   ;;  %s699_s26 = smov 0  }
   0x6 LB: > { %s454_s27 = sadd.s32 4294967295, %s649_s26   ;;  %s455_s28 = sadd.s32 4294967294, %s649_s26   ;;  %s649_s26 = sphi %s699_s26, %s22_s26   ;;  %s645_s25 = sphi %s697_s25, %s901_s25   ;;  %s641_s24 = sphi %s695_s24, %s900_s24   ;;  %s637_s23 = sphi %s693_s23, %s899_s23   ;;  %s633_s22 = sphi %s691_s22, %s898_s22   ;;  %s629_s21 = sphi %s689_s21, %s897_s21  }
   0x7   : > { %s34_s29 = sadd.s32 1, %s645_s25  ;;  %s69_s30 = sadd.s32 1, %s637_s23 }
   0x8   : > { %p36_p0 = scmp.ge.s32.totalorder %s34_s29, 2  ;;  %p76_p1 = scmp.ne.s32.totalorder %s637_s23, %s633_s22 }
   0x9   : > { %p77_p2 = scmp.eq.s32.totalorder %s649_s26, 0  ;;  %p82_p3 = scmp.ne.s32.totalorder %s633_s22, %s629_s21 }
   0xa   : > { %s903_s29 = smov (%p36_p0, %s34_s29), 0  ;;  %p83_p5 = scmp.eq.s32.totalorder %s454_s27, 0 }
   0xb   : > { %p730_p4 = por %p77_p2, %p76_p1  ;;  %s66_s8 = ssub.s32 %s645_s25, %s903_s29 }
   0xc   : > { %p192_p6 = scmp.eq.s32.totalorder %s454_s27, 1  ;;  %p67_p7 = scmp.eq.s32.totalorder %s66_s8, 0 }
   0xd   : > { %p736_p8 = por %p83_p5, %p82_p3  ;;  %p198_p10 = scmp.eq.s32.totalorder %s455_s28, 1 }
   0xe   : > { %p740_p9 = por %p192_p6, %p76_p1  ;;  %p480_p13 = scmp.lt.s32.totalorder %s649_s26, 2 }
   0xf   : > { %s745_s11 = scalar_select %p67_p7, %s637_s23, %s69_s30  }
  0x10   : > { %s889_s10 = scalar_select %p740_p9, 1, 0 }
  0x11   : > { %p747_p11 = por %p198_p10, %p82_p3  ;;  %s240_s13 = sand.u32 1, %s637_s23  }
  0x12   : > { %s458_s14 = sshll.u32 %s645_s25, 4  ;;  %s243_s15 = scalar_lea.vmem [#allocation2], %s240_s13 }
  0x13   : > { %s890_s12 = scalar_select %p747_p11, 1, 0 }
  0x14   : > { %s250_s16 = sshll.u32 %s243_s15, 4  ;;  %s758_s19 = scalar_lea.hbm %s880_s1, %s458_s14  ;;  %s760_s16 = int_to_ptr.vmem [resolvable:$true] %s250_s16 }
  0x15   : > { %p764_p0 = pnand %p480_p13, %p730_p4  ;;  %s241_s27 = scalar_lea.sflag [#allocation3], %s240_s13 }
  0x16   : > { %s537_s28 = scalar_lea.hbm %s758_s19, 16  ;;  %s542_s7 = scalar_lea.hbm %s880_s1, 32 }
  0x17   : > { %p538_p3 = scmp.ne.s32.totalorder %s758_s19, %s537_s28  ;;  %p539_p5 = pneg %p764_p0 }
  0x18   : > { %p543_p4 = scmp.lt.u32.totalorder %s758_s19, %s880_s1  ;;  %p544_p10 = scmp.lt.u32.totalorder %s542_s7, %s537_s28 }
  0x19   : > { %p540_p6 = pnand %p539_p5, %p538_p3  ;;  %p546_p12 = scmp.lt.u32.totalorder %s537_s28, %s758_s19 }
  0x1a   : > { %p545_p13 = por %p544_p10, %p543_p4 }
  0x1b   : > { %p541_p7 = pneg %p540_p6 }
  0x1c   : > { %p547_p1 = por %p546_p12, %p545_p13 }
  0x1e   : > { %p548_p2 = pnand %p547_p1, %p541_p7 }
  0x20   : > { %551 = shalt.err (!%p548_p2)
}
  0x21   : > { %s552_s13 = scalar_lea.vmem %s760_s16, 16  ;;  %s651_s17 = smov [#allocation2]  }
  0x22   : > { %p553_p3 = scmp.ne.s32.totalorder %s760_s16, %s552_s13  ;;  %s557_s18 = sshll.u32 %s651_s17, 4  ;;  %s558_s18 = int_to_ptr.vmem [resolvable:$false] %s557_s18 }
  0x23   : > { %s559_s30 = scalar_lea.vmem %s558_s18, 32  ;;  %p560_p9 = scmp.lt.s32.totalorder %s760_s16, %s558_s18 }
  0x24   : > { %p555_p6 = pnand %p553_p3, %p539_p5  ;;  %p561_p4 = scmp.lt.s32.totalorder %s559_s30, %s552_s13 }
  0x26   : > { %p556_p11 = pneg %p555_p6  ;;  %p562_p10 = por %p561_p4, %p560_p9 }
  0x28   : > { %p563_p12 = pnand %p562_p10, %p556_p11 }
  0x2a   : > { %566 = shalt.err (!%p563_p12)
}
  0x2b   : > { %475 = dma.hbm_to_vmem [thread:$0]  (!%p764_p0), %s758_s19, 16, %s760_s16, %s241_s27  }
  0x2c   : > { %p892_p1 = scmp.lt.s32.totalorder %s649_s26, 3  ;;  %p893_p2 = scmp.ge.s32.totalorder %s649_s26, 1 }
  0x2e   : > { %p256_p5 = pnand %p893_p2, %p892_p1 }
  0x2f   : > { %s800_s28 = sand.u32 (!%p256_p5), 1, %s633_s22  }
  0x30   : > { %259 = sbr.rel (%p256_p5) target bundleno = 379 (0x17b), region = 44  ;;  %s262_s8 = scalar_lea.sflag (!%p256_p5), [#allocation3], %s800_s28 }
  0x31   : > { %s264_s7 = scalar_lea.vmem (!%p256_p5), [#allocation2], %s800_s28 }
  0x37   : > { %620 = dma.done.wait (%p736_p8), %s262_s8, 16  }
  0x38   : > { %622 = vsyncadd (%p736_p8), %s262_s8, 4294967280  ;;  %v462_v0 = vld [vmem:[%s264_s7] ss:$0 sm:$0xff]  ;;  %vm316_vm0 = vcmask 64512   ;;  %v652_v7 = vmov 0   ;;  %p299_p8 = scmp.lt.s32.totalorder %s641_s24, 1 }
  0x39   : > { %v307_v1 = vld [vmem:[%s881_s2] sm:$0xff]  ;;  %531 = vset.pattern.permute.xlu1 %v652_v7  ;;  %532 = vset.pattern.permute.xlu0 %v652_v7  ;;  %s460_s30 = sshll.u32 %s800_s28, 3  ;;  %s465_s16 = sshll.u32 %s641_s24, 7 }
  0x3a   : > { %v308_v2 = vld [vmem:[%s883_s4] sm:$0xff]  ;;  %v315_v3 = vmul.f32 %v462_v0, %v307_v1  ;;  %s300_s17 = scalar_select %p299_p8, %s641_s24, 1 }
  0x3b   : > { %v322_v4 = vmul.f32 %v462_v0, %v308_v2  ;;  %v320_v8 = vld [vmem:[%s882_s3] sm:$0xff]  ;;  %s298_s19 = scalar_lea.vmem [#allocation5], %s460_s30  ;;  %s830_s15 = scalar_lea.hbm %s885_s6, %s465_s16 }
  0x3c   : > { %v317_v5 = vsel %vm316_vm0, %v315_v3, 0.0  ;;  %v326_v14 = vld [vmem:[%s884_s5] sm:$0xff]  ;;  %s461_s18 = sshll.u32 %s300_s17, 3  ;;  %s363_s27 = sshll.u32 %s298_s19, 4  ;;  %s832_s27 = int_to_ptr.vmem [resolvable:$true] %s363_s27 }
  0x3d   : > { %318 = vadd.xlane.f32.xlu0 %v317_v5  ;;  %v323_v6 = vsel %vm316_vm0, %v322_v4, 0.0  ;;  %s305_s20 = scalar_lea.vmem %s879_s0, %s461_s18  ;;  %s349_s13 = scalar_lea.sflag [#allocation4], %s800_s28 }
  0x3e   : > { %v334_v18 = vld [vmem:[%s305_s20] sm:$0xff]  ;;  %s567_s17 = scalar_lea.vmem %s832_s27, 128  ;;  %p894_p11 = scmp.ne.s32.totalorder %s889_s10, 0 }
  0x3f   : > { %p568_p9 = scmp.ne.s32.totalorder %s832_s27, %s567_s17  ;;  %s653_s24 = smov [#allocation5]  }
  0x40   : > { %s571_s18 = sshll.u32 %s653_s24, 4  ;;  %s572_s18 = int_to_ptr.vmem [resolvable:$false] %s571_s18 }
  0x41   : > { %324 = vadd.xlane.f32.xlu0 %v323_v6  ;;  %p569_p0 = pnand %p568_p9, %p894_p11  ;;  %s573_s30 = scalar_lea.vmem %s572_s18, 256 }
  0x42   : > { %p574_p13 = scmp.lt.s32.totalorder %s832_s27, %s572_s18  ;;  %p575_p3 = scmp.lt.s32.totalorder %s573_s30, %s567_s17 }
  0x43   : > { %p570_p7 = pneg %p569_p0 }
  0x44   : > { %p576_p6 = por %p575_p3, %p574_p13 }
  0x46   : > { %p577_p4 = pnand %p576_p6, %p570_p7 }
  0xca   : > { %v319_v9 = vpop.xlane.xlu0 %318 }
  0xcb   : > { %v321_v10 = vadd.f32 %v320_v8, %v319_v9 }
  0xcd   : > { %v463_v11 = vmul.f32 -1.442695, %v321_v10 }
  0xce   : > { %v325_v15 = vpop.xlane.xlu0 %324 }
  0xcf   : > { %533 = vpow2.f32 %v463_v11  ;;  %v327_v17 = vadd.f32 %v326_v14, %v325_v15 }
  0xd9   : > { %v534_v12 = vpop.eup %533 }
  0xda   : > { %v331_v13 = vadd.f32 1.0, %v534_v12 }
  0xdc   : > { %535 = vrcp.f32 %v331_v13 }
  0xe6   : > { %v536_v16 = vpop.eup %535 }
  0xe7   : > { %337 = vperm.xlu1 %531, %v536_v16  }
  0xeb   : > { %343 = vperm.xlu1 %531, %v327_v17  }
 0x166   : > { %v338_v19 = vpop.permute.xlu1 %337 }
 0x167   : > { %v340_v20 = vmul.f32 %v338_v19, %v334_v18 }
 0x16a   : > { %v344_v21 = vpop.permute.xlu1 %343 }
 0x16b   : > { %v346_v22 = vadd.f32 %v344_v21, %v340_v20 }
 0x16d   : > { %347 = vst [vmem:[%s298_s19] sm:$0xff] %v346_v22 }
 0x16e   : > { %580 = shalt.err (!%p577_p4)
}
 0x16f   : > { %s581_s28 = scalar_lea.hbm %s830_s15, 128  ;;  %s585_s20 = scalar_lea.hbm %s885_s6, 256 }
 0x170   : > { %p582_p10 = scmp.ne.s32.totalorder %s830_s15, %s581_s28  ;;  %p586_p2 = scmp.lt.u32.totalorder %s830_s15, %s885_s6 }
 0x171   : > { %p587_p5 = scmp.lt.u32.totalorder %s585_s20, %s581_s28  ;;  %p589_p9 = scmp.lt.u32.totalorder %s581_s28, %s830_s15 }
 0x172   : > { %p583_p12 = pnand %p582_p10, %p894_p11 }
 0x173   : > { %p588_p8 = por %p587_p5, %p586_p2 }
 0x174   : > { %p584_p1 = pneg %p583_p12 }
 0x175   : > { %p590_p0 = por %p589_p9, %p588_p8 }
 0x177   : > { %p591_p7 = pnand %p590_p0, %p584_p1 }
 0x179   : > { %594 = shalt.err (!%p591_p7)
}
 0x17a   : > { %470 = dma.vmem_to_hbm [thread:$0]  (%p894_p11), %s832_s27, 128, %s830_s15, %s349_s13  }
 0x17b PF: > { %s375_s9 = sand.u32 1, %s629_s21   ;;  %p895_p13 = scmp.ne.s32.totalorder %s890_s12, 0 }
 0x17c   : > { %p896_p3 = scmp.ge.s32.totalorder %s649_s26, 2  ;;  %s376_s14 = scalar_lea.sflag [#allocation4], %s375_s9 }
 0x17e   : > { %p477_p6 = pnand %p896_p3, %p895_p13 }
 0x180   : > { %624 = dma.done.wait (!%p477_p6), %s376_s14, 128  }
 0x181   : > { %626 = vsyncadd (!%p477_p6), %s376_s14, 4294967168  ;;  %s22_s26 = sadd.s32 1, %s649_s26   ;;  %s897_s21 = smov %s633_s22 }
 0x182   : > { %p19_p4 = scmp.ge.s32.totalorder %s22_s26, 4   ;;  %s898_s22 = smov %s637_s23 }
 0x183   : > { %s899_s23 = smov %s745_s11  ;;  %s900_s24 = smov %s645_s25 }
 0x184   : > { %s901_s25 = smov %s903_s29  ;;  %21 = sbr.rel (!%p19_p4) target bundleno = 6 (0x6), region = 92 }
 0x18b   :  { %381 = vsyncpa [#allocation3], 1 }
 0x18c   :  { %383 = vsyncpa [#allocation3 + $0x1], 1 }
 0x18d   :  { %384 = vsyncpa [#allocation4], 1 }
 0x18e   :  { %386 = vsyncpa [#allocation4 + $0x1], 1 }

</bundles_post_ra>
